<compile_context>
chip_gen: v7x
topology: tpu7x:2x2x1
jax: 0.10.0
libtpu: 0.0.40
codegen_flags: <defaults>
</compile_context>

<pallas_src>
import jax
import jax.numpy as jnp
from jax import lax
from jax.experimental import pallas as pl
from jax.experimental.pallas import tpu as pltpu

SLOPE = 0.01  # nn.LeakyReLU default negative_slope


def _pick_batch_block(n_images, hw, cin, cp, vmem_cap_bytes=6 << 20):
    """Largest batch block that keeps >=2 grid steps (megacore) and a small footprint."""
    best = 1
    for b in range(1, n_images + 1):
        if n_images % b:
            continue
        if n_images >= 2 and n_images // b < 2:
            continue  # keep at least 2 'parallel' steps so both v7x TensorCores get work
        # rough per-step live bytes: stacked RHS (both convs) + m1 + x/out blocks (f32)
        est = (9 * cin + 1 + 9 * cp + 1 + 3 * cp + 2 * (cin + 1) + 2 * cp) * b * hw * 4
        if est > vmem_cap_bytes:
            continue
        best = b
    return best


def residual_block_pallas(x_nchw, params, slope=SLOPE, mxu_dtype=jnp.bfloat16):
    """ResidualBlock forward (stride=1) as one fused Pallas TPU kernel."""
    # TODO(synk): stride > 1 (downsampling) variant of the block is not implemented.
    N, Cin, H, W = x_nchw.shape
    HW = H * W
    Cout = params['conv1_w'].shape[0]
    Cp = ((Cout + 7) // 8) * 8            # pad out-channels to a sublane multiple
    f32 = jnp.float32

    conv1_w = params['conv1_w'].astype(f32)            # (Cout, Cin, 3, 3)  OIHW
    conv1_b = params['conv1_b'].astype(f32)            # (Cout,)
    conv2_w = params['conv2_w'].astype(f32)            # (Cout, Cout, 3, 3)
    conv2_b = params['conv2_b'].astype(f32)            # (Cout,)
    if 'skip_w' in params:                             # in_ch != out_ch -> 1x1 projection
        skip_w = params['skip_w'][:, :, 0, 0].astype(f32)   # (Cout, Cin)
        skip_b = params['skip_b'].astype(f32)                # (Cout,)
    else:                                              # identity shortcut
        assert Cin == Cout, "identity skip requires in_ch == out_ch"
        skip_w = jnp.eye(Cout, Cin, dtype=f32)
        skip_b = jnp.zeros((Cout,), f32)

    # ---- Fused LHS weight for matmul #1 (RHS = im2col(x) stacked with a ones row) ----
    #   rows [0  , Cp )  : conv1 (tap t occupies columns [t*Cin,(t+1)*Cin)), bias in last col
    #   rows [Cp , 2Cp)  : 1x1 skip conv on the center tap columns, skip bias in last col
    K1 = 9 * Cin + 1
    wa = jnp.zeros((2 * Cp, K1), f32)
    for t in range(9):
        dy, dx = divmod(t, 3)
        wa = wa.at[0:Cout, t * Cin:(t + 1) * Cin].set(conv1_w[:, :, dy, dx])
    wa = wa.at[0:Cout, K1 - 1].set(conv1_b)
    wa = wa.at[Cp:Cp + Cout, 4 * Cin:5 * Cin].set(skip_w)
    wa = wa.at[Cp:Cp + Cout, K1 - 1].set(skip_b)

    # ---- Fused LHS weight for matmul #2 (RHS = im2col(y1) stacked with a ones row) ----
    K2 = 9 * Cp + 1
    wb = jnp.zeros((Cp, K2), f32)
    for t in range(9):
        dy, dx = divmod(t, 3)
        wb = wb.at[0:Cout, t * Cp:t * Cp + Cout].set(conv2_w[:, :, dy, dx])
    wb = wb.at[0:Cout, K2 - 1].set(conv2_b)

    wa_m = wa.astype(mxu_dtype)          # bf16 operands -> 2-3x MXU throughput on v5e/v6e/v7x
    wb_m = wb.astype(mxu_dtype)

    # ---- Activations: lane-dense (Cin+1, N*HW), ones row folds the biases ----
    x_flat = x_nchw.astype(f32).reshape(N, Cin, HW).transpose(1, 0, 2).reshape(Cin, N * HW)
    x_aug = jnp.concatenate([x_flat, jnp.ones((1, N * HW), f32)], axis=0)

    # ---- Batch blocking ----
    B_blk = _pick_batch_block(N, HW, Cin, Cp)
    num_steps = N // B_blk
    HW_blk = B_blk * HW

    # ---- Precomputed per-pixel boundary masks for the 9 taps (hoisted out of the kernel).
    # They depend only on the local pixel, so they also zero any cross-image wrap when
    # several images share the lane axis.
    q = jnp.arange(HW, dtype=jnp.int32)
    hh, ww = q // W, q % W
    rows = []
    for t in range(9):
        oy, ox = t // 3 - 1, t % 3 - 1
        rows.append((hh + oy >= 0) & (hh + oy < H) & (ww + ox >= 0) & (ww + ox < W))
    mask_img = jnp.stack(rows, axis=0).astype(f32)              # (9, HW)
    masks_all = jnp.tile(mask_img, (1, B_blk))                  # (9, B_blk*HW)

    def kernel(x_ref, mask_ref, wa_ref, wb_ref, out_ref):
        x = x_ref[...]                         # (Cin+1, HW_blk) f32
        masks = mask_ref[...]                  # (9, HW_blk)    f32 multiplicative masks
        ones_row = x[Cin:Cin + 1, :]           # (1, HW_blk)

        def im2col(a):                         # a: (rows, HW_blk) -> (9*rows, HW_blk)
            blocks = []
            for t in range(9):
                oy, ox = t // 3 - 1, t % 3 - 1
                off = oy * W + ox              # flat spatial offset of this tap
                if off == 0:                   # center tap: no shift, always valid
                    blocks.append(a)
                else:
                    rolled = pltpu.roll(a, shift=(-off) % HW_blk, axis=1)   # XLU lane roll
                    blocks.append(rolled * masks[t:t + 1, :])               # zero padding
            return jnp.concatenate(blocks, axis=0)

        # MXU pass #1: conv1 (+b1) and the skip conv (+b_skip) in one matmul.
        rhs1 = jnp.concatenate([im2col(x[:Cin, :]), ones_row], axis=0)      # (9*Cin+1, HW_blk)
        m1 = jnp.dot(wa_ref[...], rhs1.astype(wa_ref.dtype),
                     preferred_element_type=jnp.float32)                    # (2*Cp, HW_blk)
        y1 = m1[:Cp, :]
        skip_out = m1[Cp:, :]
        y1 = jnp.maximum(y1, slope * y1)                                    # LeakyReLU (vmax)

        # MXU pass #2: conv2 (+b2 via the ones-row column).
        rhs2 = jnp.concatenate([im2col(y1), ones_row], axis=0)              # (9*Cp+1, HW_blk)
        y2 = jnp.dot(wb_ref[...], rhs2.astype(wb_ref.dtype),
                     preferred_element_type=jnp.float32)                    # (Cp, HW_blk)
        y2 = jnp.maximum(y2, slope * y2)                                    # LeakyReLU (vmax)

        out_ref[...] = (y2 + skip_out).astype(out_ref.dtype)                # + identity/skip

    out_flat = pl.pallas_call(
        kernel,
        out_shape=jax.ShapeDtypeStruct((Cp, N * HW), jnp.float32),
        grid=(num_steps,),
        in_specs=[
            pl.BlockSpec((Cin + 1, HW_blk), lambda n: (0, n)),
            pl.BlockSpec((9, HW_blk), lambda n: (0, 0)),        # masks resident
            pl.BlockSpec(wa_m.shape, lambda n: (0, 0)),         # weights resident
            pl.BlockSpec(wb_m.shape, lambda n: (0, 0)),
        ],
        out_specs=pl.BlockSpec((Cp, HW_blk), lambda n: (0, n)),
        compiler_params=pltpu.CompilerParams(dimension_semantics=("parallel",)),
    )(x_aug, masks_all, wa_m, wb_m)

    out = out_flat.reshape(Cp, N, HW).transpose(1, 0, 2)[:, :Cout, :]
    return out.reshape(N, Cout, H, W)


def residual_block_reference(x, params, slope=SLOPE):
    """Pure-JAX / XLA reference matching the PyTorch ResidualBlock (NCHW, stride=1)."""
    dn = ('NCHW', 'OIHW', 'NCHW')

    def conv(inp, w, padding):
        return lax.conv_general_dilated(
            inp, w, window_strides=(1, 1), padding=padding,
            dimension_numbers=dn, precision=lax.Precision.HIGHEST)

    y = conv(x, params['conv1_w'], ((1, 1), (1, 1))) + params['conv1_b'][None, :, None, None]
    y = jnp.where(y >= 0, y, slope * y)
    y = conv(y, params['conv2_w'], ((1, 1), (1, 1))) + params['conv2_b'][None, :, None, None]
    y = jnp.where(y >= 0, y, slope * y)
    if 'skip_w' in params:
        ident = conv(x, params['skip_w'], 'VALID') + params['skip_b'][None, :, None, None]
    else:
        ident = x
    return y + ident


if __name__ == "__main__":
    # ResidualBlock(in_ch=4, out_ch=8, stride=1) -> skip path is a 1x1 conv.
    N, Cin, Cout, H, W = 2, 4, 8, 16, 16

    key = jax.random.PRNGKey(0)
    ks = jax.random.split(key, 7)
    params = {
        'conv1_w': 0.2 * jax.random.normal(ks[0], (Cout, Cin, 3, 3), jnp.float32),
        'conv1_b': 0.1 * jax.random.normal(ks[1], (Cout,), jnp.float32),
        'conv2_w': 0.2 * jax.random.normal(ks[2], (Cout, Cout, 3, 3), jnp.float32),
        'conv2_b': 0.1 * jax.random.normal(ks[3], (Cout,), jnp.float32),
        'skip_w':  0.2 * jax.random.normal(ks[4], (Cout, Cin, 1, 1), jnp.float32),
        'skip_b':  0.1 * jax.random.normal(ks[5], (Cout,), jnp.float32),
    }
    x = jax.random.normal(ks[6], (N, Cin, H, W), jnp.float32)

    ref = jax.block_until_ready(residual_block_reference(x, params))

    # f32 MXU operands: tight correctness check of the fused kernel math.
    out_f32 = jax.block_until_ready(
        jax.jit(lambda xx, pp: residual_block_pallas(xx, pp, mxu_dtype=jnp.float32))(x, params))
    assert out_f32.shape == (N, Cout, H, W), out_f32.shape
    err32 = jnp.max(jnp.abs(out_f32 - ref))
    assert jnp.allclose(out_f32, ref, rtol=2e-3, atol=2e-3), f"f32 max abs err = {err32}"

    # bf16 MXU operands (perf default for v5e/v6e/v7x): looser tolerance from operand rounding.
    out_bf16 = jax.block_until_ready(
        jax.jit(lambda xx, pp: residual_block_pallas(xx, pp, mxu_dtype=jnp.bfloat16))(x, params))
    assert out_bf16.shape == (N, Cout, H, W), out_bf16.shape
    err16 = jnp.max(jnp.abs(out_bf16 - ref))
    assert jnp.allclose(out_bf16, ref, rtol=1e-2, atol=1e-1), f"bf16 max abs err = {err16}"

    print("KERNEL_OK")
</pallas_src>

<mosaic_0001>
module attributes {stable_mosaic.version = 11 : i64} {
  func.func @kernel(%arg0: i32, %arg1: memref<5x256xf32, #tpu.memory_space<vmem>>, %arg2: memref<9x256xf32, #tpu.memory_space<vmem>>, %arg3: memref<16x37xf32, #tpu.memory_space<vmem>>, %arg4: memref<8x73xf32, #tpu.memory_space<vmem>>, %arg5: memref<8x256xf32, #tpu.memory_space<vmem>>) attributes {dimension_semantics = [#tpu.dimension_semantics<parallel>], iteration_bounds = array<i64: 2>, scalar_prefetch = 0 : i64, scratch_operands = 0 : i64, tpu.core_type = #tpu.core_type<tc>, window_params = [{transform_indices = @transform_0, window_bounds = array<i64: 5, 256>}, {pipeline_mode = #tpu.pipeline_mode<synchronous>, transform_indices = @transform_1, window_bounds = array<i64: 9, 256>}, {pipeline_mode = #tpu.pipeline_mode<synchronous>, transform_indices = @transform_2, window_bounds = array<i64: 16, 37>}, {pipeline_mode = #tpu.pipeline_mode<synchronous>, transform_indices = @transform_3, window_bounds = array<i64: 8, 73>}, {transform_indices = @transform_4, window_bounds = array<i64: 8, 256>}]} {
    %c0 = arith.constant 0 : index
    %c0_0 = arith.constant 0 : index
    %0 = vector.load %arg1[%c0, %c0_0] : memref<5x256xf32, #tpu.memory_space<vmem>>, vector<5x256xf32>
    %c0_1 = arith.constant 0 : index
    %c0_2 = arith.constant 0 : index
    %1 = vector.load %arg2[%c0_1, %c0_2] : memref<9x256xf32, #tpu.memory_space<vmem>>, vector<9x256xf32>
    %2 = vector.extract_strided_slice %0 {offsets = [4, 0], sizes = [1, 256], strides = [1, 1]} : vector<5x256xf32> to vector<1x256xf32>
    %3 = vector.extract_strided_slice %0 {offsets = [0, 0], sizes = [4, 256], strides = [1, 1]} : vector<5x256xf32> to vector<4x256xf32>
    %c17_i32 = arith.constant 17 : i32
    %4 = tpu.dynamic_rotate %3 by %c17_i32 dim 1 : vector<4x256xf32>, i32 -> vector<4x256xf32>
    %5 = vector.extract_strided_slice %1 {offsets = [0, 0], sizes = [1, 256], strides = [1, 1]} : vector<9x256xf32> to vector<1x256xf32>
    %6 = vector.broadcast %5 : vector<1x256xf32> to vector<4x256xf32>
    %7 = arith.mulf %4, %6 : vector<4x256xf32>
    %c16_i32 = arith.constant 16 : i32
    %8 = tpu.dynamic_rotate %3 by %c16_i32 dim 1 : vector<4x256xf32>, i32 -> vector<4x256xf32>
    %9 = vector.extract_strided_slice %1 {offsets = [1, 0], sizes = [1, 256], strides = [1, 1]} : vector<9x256xf32> to vector<1x256xf32>
    %10 = vector.broadcast %9 : vector<1x256xf32> to vector<4x256xf32>
    %11 = arith.mulf %8, %10 : vector<4x256xf32>
    %c15_i32 = arith.constant 15 : i32
    %12 = tpu.dynamic_rotate %3 by %c15_i32 dim 1 : vector<4x256xf32>, i32 -> vector<4x256xf32>
    %13 = vector.extract_strided_slice %1 {offsets = [2, 0], sizes = [1, 256], strides = [1, 1]} : vector<9x256xf32> to vector<1x256xf32>
    %14 = vector.broadcast %13 : vector<1x256xf32> to vector<4x256xf32>
    %15 = arith.mulf %12, %14 : vector<4x256xf32>
    %c1_i32 = arith.constant 1 : i32
    %16 = tpu.dynamic_rotate %3 by %c1_i32 dim 1 : vector<4x256xf32>, i32 -> vector<4x256xf32>
    %17 = vector.extract_strided_slice %1 {offsets = [3, 0], sizes = [1, 256], strides = [1, 1]} : vector<9x256xf32> to vector<1x256xf32>
    %18 = vector.broadcast %17 : vector<1x256xf32> to vector<4x256xf32>
    %19 = arith.mulf %16, %18 : vector<4x256xf32>
    %c255_i32 = arith.constant 255 : i32
    %20 = tpu.dynamic_rotate %3 by %c255_i32 dim 1 : vector<4x256xf32>, i32 -> vector<4x256xf32>
    %21 = vector.extract_strided_slice %1 {offsets = [5, 0], sizes = [1, 256], strides = [1, 1]} : vector<9x256xf32> to vector<1x256xf32>
    %22 = vector.broadcast %21 : vector<1x256xf32> to vector<4x256xf32>
    %23 = arith.mulf %20, %22 : vector<4x256xf32>
    %c241_i32 = arith.constant 241 : i32
    %24 = tpu.dynamic_rotate %3 by %c241_i32 dim 1 : vector<4x256xf32>, i32 -> vector<4x256xf32>
    %25 = vector.extract_strided_slice %1 {offsets = [6, 0], sizes = [1, 256], strides = [1, 1]} : vector<9x256xf32> to vector<1x256xf32>
    %26 = vector.broadcast %25 : vector<1x256xf32> to vector<4x256xf32>
    %27 = arith.mulf %24, %26 : vector<4x256xf32>
    %c240_i32 = arith.constant 240 : i32
    %28 = tpu.dynamic_rotate %3 by %c240_i32 dim 1 : vector<4x256xf32>, i32 -> vector<4x256xf32>
    %29 = vector.extract_strided_slice %1 {offsets = [7, 0], sizes = [1, 256], strides = [1, 1]} : vector<9x256xf32> to vector<1x256xf32>
    %30 = vector.broadcast %29 : vector<1x256xf32> to vector<4x256xf32>
    %31 = arith.mulf %28, %30 : vector<4x256xf32>
    %c239_i32 = arith.constant 239 : i32
    %32 = tpu.dynamic_rotate %3 by %c239_i32 dim 1 : vector<4x256xf32>, i32 -> vector<4x256xf32>
    %33 = vector.extract_strided_slice %1 {offsets = [8, 0], sizes = [1, 256], strides = [1, 1]} : vector<9x256xf32> to vector<1x256xf32>
    %34 = vector.broadcast %33 : vector<1x256xf32> to vector<4x256xf32>
    %35 = arith.mulf %32, %34 : vector<4x256xf32>
    %36 = tpu.concatenate %7, %11, %15, %19, %3, %23, %27, %31, %35 in 0 : vector<4x256xf32>, vector<4x256xf32>, vector<4x256xf32>, vector<4x256xf32>, vector<4x256xf32>, vector<4x256xf32>, vector<4x256xf32>, vector<4x256xf32>, vector<4x256xf32> -> vector<36x256xf32>
    %37 = tpu.concatenate %36, %2 in 0 : vector<36x256xf32>, vector<1x256xf32> -> vector<37x256xf32>
    %c0_3 = arith.constant 0 : index
    %c0_4 = arith.constant 0 : index
    %38 = vector.load %arg3[%c0_3, %c0_4] : memref<16x37xf32, #tpu.memory_space<vmem>>, vector<16x37xf32>
    %cst = arith.constant dense<0.000000e+00> : vector<16x256xf32>
    %39 = tpu.matmul %38, %37, %cst {dimension_numbers = #tpu.dot_dimension_numbers<[1], [0], [0], [1], [0, 0, 1, 1], [], []>} : vector<16x37xf32>, vector<37x256xf32>, vector<16x256xf32> -> vector<16x256xf32>
    %40 = vector.extract_strided_slice %39 {offsets = [0, 0], sizes = [8, 256], strides = [1, 1]} : vector<16x256xf32> to vector<8x256xf32>
    %41 = vector.extract_strided_slice %39 {offsets = [8, 0], sizes = [8, 256], strides = [1, 1]} : vector<16x256xf32> to vector<8x256xf32>
    %cst_5 = arith.constant 0.00999999977 : f32
    %42 = vector.broadcast %cst_5 : f32 to vector<8x256xf32>
    %43 = arith.mulf %42, %40 : vector<8x256xf32>
    %44 = arith.maximumf %40, %43 : vector<8x256xf32>
    %c17_i32_6 = arith.constant 17 : i32
    %45 = tpu.dynamic_rotate %44 by %c17_i32_6 dim 1 : vector<8x256xf32>, i32 -> vector<8x256xf32>
    %46 = vector.extract_strided_slice %1 {offsets = [0, 0], sizes = [1, 256], strides = [1, 1]} : vector<9x256xf32> to vector<1x256xf32>
    %47 = vector.broadcast %46 : vector<1x256xf32> to vector<8x256xf32>
    %48 = arith.mulf %45, %47 : vector<8x256xf32>
    %c16_i32_7 = arith.constant 16 : i32
    %49 = tpu.dynamic_rotate %44 by %c16_i32_7 dim 1 : vector<8x256xf32>, i32 -> vector<8x256xf32>
    %50 = vector.extract_strided_slice %1 {offsets = [1, 0], sizes = [1, 256], strides = [1, 1]} : vector<9x256xf32> to vector<1x256xf32>
    %51 = vector.broadcast %50 : vector<1x256xf32> to vector<8x256xf32>
    %52 = arith.mulf %49, %51 : vector<8x256xf32>
    %c15_i32_8 = arith.constant 15 : i32
    %53 = tpu.dynamic_rotate %44 by %c15_i32_8 dim 1 : vector<8x256xf32>, i32 -> vector<8x256xf32>
    %54 = vector.extract_strided_slice %1 {offsets = [2, 0], sizes = [1, 256], strides = [1, 1]} : vector<9x256xf32> to vector<1x256xf32>
    %55 = vector.broadcast %54 : vector<1x256xf32> to vector<8x256xf32>
    %56 = arith.mulf %53, %55 : vector<8x256xf32>
    %c1_i32_9 = arith.constant 1 : i32
    %57 = tpu.dynamic_rotate %44 by %c1_i32_9 dim 1 : vector<8x256xf32>, i32 -> vector<8x256xf32>
    %58 = vector.extract_strided_slice %1 {offsets = [3, 0], sizes = [1, 256], strides = [1, 1]} : vector<9x256xf32> to vector<1x256xf32>
    %59 = vector.broadcast %58 : vector<1x256xf32> to vector<8x256xf32>
    %60 = arith.mulf %57, %59 : vector<8x256xf32>
    %c255_i32_10 = arith.constant 255 : i32
    %61 = tpu.dynamic_rotate %44 by %c255_i32_10 dim 1 : vector<8x256xf32>, i32 -> vector<8x256xf32>
    %62 = vector.extract_strided_slice %1 {offsets = [5, 0], sizes = [1, 256], strides = [1, 1]} : vector<9x256xf32> to vector<1x256xf32>
    %63 = vector.broadcast %62 : vector<1x256xf32> to vector<8x256xf32>
    %64 = arith.mulf %61, %63 : vector<8x256xf32>
    %c241_i32_11 = arith.constant 241 : i32
    %65 = tpu.dynamic_rotate %44 by %c241_i32_11 dim 1 : vector<8x256xf32>, i32 -> vector<8x256xf32>
    %66 = vector.extract_strided_slice %1 {offsets = [6, 0], sizes = [1, 256], strides = [1, 1]} : vector<9x256xf32> to vector<1x256xf32>
    %67 = vector.broadcast %66 : vector<1x256xf32> to vector<8x256xf32>
    %68 = arith.mulf %65, %67 : vector<8x256xf32>
    %c240_i32_12 = arith.constant 240 : i32
    %69 = tpu.dynamic_rotate %44 by %c240_i32_12 dim 1 : vector<8x256xf32>, i32 -> vector<8x256xf32>
    %70 = vector.extract_strided_slice %1 {offsets = [7, 0], sizes = [1, 256], strides = [1, 1]} : vector<9x256xf32> to vector<1x256xf32>
    %71 = vector.broadcast %70 : vector<1x256xf32> to vector<8x256xf32>
    %72 = arith.mulf %69, %71 : vector<8x256xf32>
    %c239_i32_13 = arith.constant 239 : i32
    %73 = tpu.dynamic_rotate %44 by %c239_i32_13 dim 1 : vector<8x256xf32>, i32 -> vector<8x256xf32>
    %74 = vector.extract_strided_slice %1 {offsets = [8, 0], sizes = [1, 256], strides = [1, 1]} : vector<9x256xf32> to vector<1x256xf32>
    %75 = vector.broadcast %74 : vector<1x256xf32> to vector<8x256xf32>
    %76 = arith.mulf %73, %75 : vector<8x256xf32>
    %77 = tpu.concatenate %48, %52, %56, %60, %44, %64, %68, %72, %76 in 0 : vector<8x256xf32>, vector<8x256xf32>, vector<8x256xf32>, vector<8x256xf32>, vector<8x256xf32>, vector<8x256xf32>, vector<8x256xf32>, vector<8x256xf32>, vector<8x256xf32> -> vector<72x256xf32>
    %78 = tpu.concatenate %77, %2 in 0 : vector<72x256xf32>, vector<1x256xf32> -> vector<73x256xf32>
    %c0_14 = arith.constant 0 : index
    %c0_15 = arith.constant 0 : index
    %79 = vector.load %arg4[%c0_14, %c0_15] : memref<8x73xf32, #tpu.memory_space<vmem>>, vector<8x73xf32>
    %cst_16 = arith.constant dense<0.000000e+00> : vector<8x256xf32>
    %80 = tpu.matmul %79, %78, %cst_16 {dimension_numbers = #tpu.dot_dimension_numbers<[1], [0], [0], [1], [0, 0, 1, 1], [], []>} : vector<8x73xf32>, vector<73x256xf32>, vector<8x256xf32> -> vector<8x256xf32>
    %cst_17 = arith.constant 0.00999999977 : f32
    %81 = vector.broadcast %cst_17 : f32 to vector<8x256xf32>
    %82 = arith.mulf %81, %80 : vector<8x256xf32>
    %83 = arith.maximumf %80, %82 : vector<8x256xf32>
    %84 = arith.addf %83, %41 : vector<8x256xf32>
    %c0_18 = arith.constant 0 : index
    %c0_19 = arith.constant 0 : index
    %85 = vector.load %arg5[%c0_18, %c0_19] : memref<8x256xf32, #tpu.memory_space<vmem>>, vector<8x256xf32>
    tpu.vector_store %arg5[%c0_18, %c0_19], %84 {strides = array<i32>} : memref<8x256xf32, #tpu.memory_space<vmem>>, vector<8x256xf32>,
    return
  }
  func.func @transform_0(%arg0: i32) -> (i32, i32) {
    %c0_i32 = arith.constant 0 : i32
    %c0_i32_0 = arith.constant 0 : i32
    return %c0_i32, %arg0 : i32, i32
  }
  func.func @transform_1(%arg0: i32) -> (i32, i32) {
    %c0_i32 = arith.constant 0 : i32
    %c0_i32_0 = arith.constant 0 : i32
    %c0_i32_1 = arith.constant 0 : i32
    return %c0_i32, %c0_i32_0 : i32, i32
  }
  func.func @transform_2(%arg0: i32) -> (i32, i32) {
    %c0_i32 = arith.constant 0 : i32
    %c0_i32_0 = arith.constant 0 : i32
    %c0_i32_1 = arith.constant 0 : i32
    return %c0_i32, %c0_i32_0 : i32, i32
  }
  func.func @transform_3(%arg0: i32) -> (i32, i32) {
    %c0_i32 = arith.constant 0 : i32
    %c0_i32_0 = arith.constant 0 : i32
    %c0_i32_1 = arith.constant 0 : i32
    return %c0_i32, %c0_i32_0 : i32, i32
  }
  func.func @transform_4(%arg0: i32) -> (i32, i32) {
    %c0_i32 = arith.constant 0 : i32
    %c0_i32_0 = arith.constant 0 : i32
    return %c0_i32, %arg0 : i32, i32
  }
}

</mosaic_0001>

<bundles_post_ra>
// kernel: _lambda_.1
= control target key start
LH: loop header
LB: loop body
LE: loop exit
PB: predicated region body
PF: predicated region fallthrough
CT: control target
= control target key end

     0   :  { %s801_s15 = smov 0   ;;  %s1095_s0 = inlined_call_operand.vmem [shape: f32[5,512], index: 0, kind: input, shape index: {}]   ;;  %s1096_s1 = inlined_call_operand.vmem [shape: f32[9,256], index: 1, kind: input, shape index: {}]   ;;  %s1097_s2 = inlined_call_operand.vmem [shape: f32[16,37], index: 2, kind: input, shape index: {}]   ;;  %s1098_s3 = inlined_call_operand.vmem [shape: f32[8,73], index: 3, kind: input, shape index: {}]   ;;  %s1099_s4 = inlined_call_operand.vmem [shape: f32[8,512], index: 4, kind: output, shape index: {}]  }
   0x1 LB: > { %s690_s16 = sadd.s32 4294967295, %s764_s15   ;;  %p694_p0 = scmp.ge.s32.totalorder %s764_s15, 1  ;;  %s764_s15 = sphi %s801_s15, %s14_s15  }
   0x2   : > { %p163_p1 = scmp.lt.s32.totalorder %s764_s15, 3 }
   0x4   : > { %p164_p2 = pnand %p694_p0, %p163_p1 }
   0x5   : > { %s695_s17 = sshll.u32 (!%p164_p2), %s690_s16, 1  ;;  %s766_s22 = smov (!%p164_p2), 1   ;;  %v772_v2 = vmov (!%p164_p2), 0.0   ;;  %v211_v3 = vlaneseq (!%p164_p2)  ;;  %v863_v9 = vld [vmem:[%s1096_s1] sm:$0xff] (!%p164_p2)  ;;  %v868_v10 = vld [vmem:[%s1096_s1 + $0x8] sm:$0xff] (!%p164_p2)  ;;  %vm369_vm4 = vcmask (!%p164_p2), 1043456  }
   0x6   : > { %167 = sbr.rel (%p164_p2) target bundleno = 757 (0x2f5), region = 36  ;;  %p190_p3 = scmp.lt.s32.totalorder (!%p164_p2), %s695_s17, 3  ;;  %460 = vmatprep.mubr.f32.mxu0 (!%p164_p2), %v772_v2  ;;  %619 = vmatprep.mubr.f32.mxu1 (!%p164_p2), %v772_v2  ;;  %vm389_vm9 = vcmask (!%p164_p2), 1044480   ;;  %vm382_vm10 = vcmask (!%p164_p2), 302080   ;;  %vm550_vm11 = vcmask (!%p164_p2), 1040384   ;;  %vm775_vm12 = vmmov (!%p164_p2), 1  }
   0x7   : > { %s767_s23 = smov (!%p164_p2), 16   ;;  %s768_s24 = smov (!%p164_p2), 17   ;;  %v855_v4 = vshrl.u32 (!%p164_p2), %v211_v3, 7  ;;  %v857_v5 = vand.u32 (!%p164_p2), 127, %v211_v3  ;;  %vm735_vm13 = vmpackc.low (!%p164_p2), %vm550_vm11, %vm775_vm12  ;;  %vm546_vm14 = vcmask (!%p164_p2), 596992  }
   0x8   : > { %s769_s25 = smov (!%p164_p2), 15   ;;  %s770_s26 = smov (!%p164_p2), 127  }
   0x9   : > { %s771_s27 = smov (!%p164_p2), 112   ;;  %s773_s28 = smov (!%p164_p2), 113   ;;  %v269_v8 = vsub.s32 (!%p164_p2), 3, %v855_v4  ;;  %v235_v11 = vsub.s32 (!%p164_p2), 1, %v855_v4  ;;  %vm264_vm0 = vcmp.lt.s32.totalorder (!%p164_p2), %v857_v5, 1  ;;  %vm230_vm1 = vcmp.lt.s32.totalorder (!%p164_p2), %v857_v5, 16 }
   0xa   : > { %s774_s29 = smov (!%p164_p2), 111   ;;  %v218_v14 = vsub.s32 (!%p164_p2), 0, %v855_v4  ;;  %vm213_vm2 = vcmp.lt.s32.totalorder (!%p164_p2), %v857_v5, 17  ;;  %v252_v17 = vsub.s32 (!%p164_p2), 2, %v855_v4  ;;  %vm247_vm3 = vcmp.lt.s32.totalorder (!%p164_p2), %v857_v5, 15 }
   0xb   : > { %v875_v15 = vrot.slane (!%p164_p2), %v863_v9, %v269_v8  ;;  %v878_v16 = vrot.slane (!%p164_p2), %v868_v10, %v269_v8  ;;  %v887_v20 = vrot.slane (!%p164_p2), %v863_v9, %v235_v11  ;;  %v890_v21 = vrot.slane (!%p164_p2), %v868_v10, %v235_v11 }
   0xc   : > { %v897_v25 = vrot.slane (!%p164_p2), %v863_v9, %v218_v14  ;;  %v900_v26 = vrot.slane (!%p164_p2), %v868_v10, %v218_v14  ;;  %v912_v34 = vrot.slane (!%p164_p2), %v863_v9, %v252_v17  ;;  %v915_v35 = vrot.slane (!%p164_p2), %v868_v10, %v252_v17 }
   0xd   : > { %s1101_s17 = smov (!%p190_p3, %s695_s17), 3  ;;  %v286_v36 = vsub.s32 5, %v855_v4  ;;  %vm281_vm5 = vcmp.lt.s32.totalorder %v857_v5, 127  ;;  %v320_v41 = vsub.s32 7, %v855_v4  ;;  %vm315_vm6 = vcmp.lt.s32.totalorder %v857_v5, 112 }
   0xe   : > { %s696_s18 = sshll.u32 %s1101_s17, 3  ;;  %v303_v3 = vsub.s32 6, %v855_v4  ;;  %vm298_vm7 = vcmp.lt.s32.totalorder %v857_v5, 113  ;;  %vm332_vm8 = vcmp.lt.s32.totalorder %v857_v5, 111 }
   0xf   : > { %s193_s21 = scalar_lea.vmem %s1095_s0, %s696_s18  ;;  %v929_v50 = vrot.slane %v863_v9, %v286_v36  ;;  %v932_v51 = vrot.slane %v868_v10, %v286_v36  ;;  %v944_v62 = vrot.slane %v863_v9, %v320_v41  ;;  %v947_v63 = vrot.slane %v868_v10, %v320_v41 }
  0x10   : > { %v817_v0 = vld [vmem:[%s193_s21] sm:$0x1f]  ;;  %v823_v1 = vld [vmem:[%s193_s21 + $0x8] sm:$0x1f]  ;;  %v960_v17 = vrot.slane %v863_v9, %v303_v3 }
  0x11   : > { %260 = vrot.lane.b32.xlu1 %v817_v0, %s766_s22  ;;  %226 = vrot.lane.b32.xlu0 %v817_v0, %s767_s23 }
  0x15   : > { %262 = vrot.lane.b32.xlu1 %v823_v1, %s766_s22  ;;  %228 = vrot.lane.b32.xlu0 %v823_v1, %s767_s23 }
  0x19   : > { %209 = vrot.lane.b32.xlu1 %v823_v1, %s768_s24  ;;  %207 = vrot.lane.b32.xlu0 %v817_v0, %s768_s24 }
  0x1d   : > { %245 = vrot.lane.b32.xlu1 %v823_v1, %s769_s25  ;;  %243 = vrot.lane.b32.xlu0 %v817_v0, %s769_s25 }
  0x21   : > { %279 = vrot.lane.b32.xlu1 %v823_v1, %s770_s26  ;;  %277 = vrot.lane.b32.xlu0 %v817_v0, %s770_s26 }
  0x25   : > { %313 = vrot.lane.b32.xlu1 %v823_v1, %s771_s27  ;;  %311 = vrot.lane.b32.xlu0 %v817_v0, %s771_s27 }
  0x29   : > { %296 = vrot.lane.b32.xlu1 %v823_v1, %s773_s28  ;;  %294 = vrot.lane.b32.xlu0 %v817_v0, %s773_s28 }
  0x2d   : > { %330 = vrot.lane.b32.xlu1 %v823_v1, %s774_s29  ;;  %328 = vrot.lane.b32.xlu0 %v817_v0, %s774_s29 }
  0x83   : > { %v261_v6 = vpop.permute.xlu1 %260  ;;  %v227_v7 = vpop.permute.xlu0 %226 }
  0x87   : > { %v263_v12 = vpop.permute.xlu1 %262  ;;  %v229_v13 = vpop.permute.xlu0 %228 }
  0x88   : > { %v265_v18 = vsel %vm264_vm0, %v261_v6, %v263_v12  ;;  %v266_v19 = vsel %vm264_vm0, %v263_v12, %v261_v6  ;;  %v231_v22 = vsel %vm230_vm1, %v227_v7, %v229_v13  ;;  %v232_v23 = vsel %vm230_vm1, %v229_v13, %v227_v7 }
  0x89   : > { %v275_v28 = vmul.f32 %v875_v15, %v266_v19  ;;  %v276_v29 = vmul.f32 %v878_v16, %v265_v18  ;;  %v241_v32 = vmul.f32 %v887_v20, %v232_v23  ;;  %v242_v33 = vmul.f32 %v890_v21, %v231_v22 }
  0x8a   : > { %v963_v18 = vrot.slane %v868_v10, %v303_v3  ;;  %v975_v10 = vld [vmem:[%s1096_s1 + $0x10] ss:$0 sm:$0xff] }
  0x8b   : > { %v210_v24 = vpop.permute.xlu1 %209  ;;  %v208_v27 = vpop.permute.xlu0 %207  ;;  %v353_v42 = vrot.slane %v275_v28, 4  ;;  %v354_v43 = vrot.slane %v276_v29, 4  ;;  %v347_v46 = vrot.slane %v241_v32, 4  ;;  %v348_v47 = vrot.slane %v242_v33, 4  ;;  %v980_v32 = vld [vmem:[%s1096_s1 + $0x18] ss:$0 sm:$0xff] }
  0x8c   : > { %v214_v30 = vsel %vm213_vm2, %v208_v27, %v210_v24  ;;  %v215_v31 = vsel %vm213_vm2, %v210_v24, %v208_v27 }
  0x8d   : > { %v224_v37 = vmul.f32 %v897_v25, %v215_v31  ;;  %v225_v38 = vmul.f32 %v900_v26, %v214_v30 }
  0x8f   : > { %v246_v39 = vpop.permute.xlu1 %245  ;;  %v244_v40 = vpop.permute.xlu0 %243  ;;  %v371_v54 = vsel %vm369_vm4, %v225_v38, %v348_v47  ;;  %v370_v56 = vsel %vm369_vm4, %v224_v37, %v347_v46 }
  0x90   : > { %v248_v44 = vsel %vm247_vm3, %v244_v40, %v246_v39  ;;  %v249_v45 = vsel %vm247_vm3, %v246_v39, %v244_v40 }
  0x91   : > { %v258_v48 = vmul.f32 %v912_v34, %v249_v45  ;;  %v259_v49 = vmul.f32 %v915_v35, %v248_v44 }
  0x93   : > { %v280_v52 = vpop.permute.xlu1 %279  ;;  %v278_v53 = vpop.permute.xlu0 %277  ;;  %v373_v55 = vsel %vm369_vm4, %v259_v49, %v354_v43  ;;  %v372_v57 = vsel %vm369_vm4, %v258_v48, %v353_v42  ;;  %v380_v49 = vld [vmem:[%s1097_s2] sm:$0xff] }
  0x94   : > { %v282_v58 = vsel %vm281_vm5, %v278_v53, %v280_v52  ;;  %v283_v59 = vsel %vm281_vm5, %v280_v52, %v278_v53  ;;  %v710_v60 = vpack.c.bf16 %v373_v55, %v371_v54  ;;  %v712_v61 = vpack.c.bf16 %v372_v57, %v370_v56 }
  0x95   : > { %v292_v6 = vmul.f32 %v929_v50, %v282_v58  ;;  %v293_v7 = vmul.f32 %v932_v51, %v283_v59 }
  0x96   : > { %711 = vmatprep.subr.bf16.mxu0 %v710_v60 }
  0x97   : > { %v314_v8 = vpop.permute.xlu1 %313  ;;  %713 = vmatpush1.bf16.msra.mxu0 %v712_v61  ;;  %v312_v11 = vpop.permute.xlu0 %311  ;;  %v359_v19 = vrot.slane %v292_v6, 4  ;;  %v360_v22 = vrot.slane %v293_v7, 4 }
  0x98   : > { %v316_v12 = vsel %vm315_vm6, %v312_v11, %v314_v8  ;;  %v317_v13 = vsel %vm315_vm6, %v314_v8, %v312_v11 }
  0x99   : > { %v326_v14 = vmul.f32 %v944_v62, %v316_v12  ;;  %v327_v4 = vmul.f32 %v947_v63, %v317_v13  ;;  %v375_v37 = vsel %vm369_vm4, %v823_v1, %v360_v22  ;;  %v374_v39 = vsel %vm369_vm4, %v817_v0, %v359_v19 }
  0x9b   : > { %v297_v23 = vpop.permute.xlu1 %296  ;;  %v295_v24 = vpop.permute.xlu0 %294  ;;  %v365_v29 = vrot.slane %v326_v14, 4  ;;  %v366_v30 = vrot.slane %v327_v4, 4 }
  0x9c   : > { %v299_v27 = vsel %vm298_vm7, %v295_v24, %v297_v23  ;;  %v300_v28 = vsel %vm298_vm7, %v297_v23, %v295_v24 }
  0x9d   : > { %v309_v9 = vmul.f32 %v960_v17, %v299_v27  ;;  %v310_v31 = vmul.f32 %v963_v18, %v300_v28 }
  0x9f   : > { %v331_v33 = vpop.permute.xlu1 %330  ;;  %v329_v36 = vpop.permute.xlu0 %328  ;;  %v377_v38 = vsel %vm369_vm4, %v310_v31, %v366_v30  ;;  %v376_v40 = vsel %vm369_vm4, %v309_v9, %v365_v29 }
  0xa0   : > { %v333_v41 = vsel %vm332_vm8, %v329_v36, %v331_v33  ;;  %v334_v42 = vsel %vm332_vm8, %v331_v33, %v329_v36  ;;  %v714_v43 = vpack.c.bf16 %v377_v38, %v375_v37  ;;  %v716_v44 = vpack.c.bf16 %v376_v40, %v374_v39 }
  0xa1   : > { %v343_v45 = vmul.f32 %v975_v10, %v333_v41  ;;  %v344_v46 = vmul.f32 %v980_v32, %v334_v42 }
  0xa2   : > { %715 = vmatprep.subr.bf16.mxu0 %v714_v43 }
  0xa3   : > { %717 = vmatpush1.bf16.msra.mxu0 %v716_v44  ;;  %v379_v47 = vsel %vm369_vm4, %v344_v46, %v823_v1  ;;  %v378_v48 = vsel %vm369_vm4, %v343_v45, %v817_v0 }
  0xa4   : > { %701 = vmatprep.subr.msk.mxu0 %vm389_vm9, %v379_v47 }
  0xa7   : > { %702 = vmatpush1.msk.msra.mxu0 %vm389_vm9, %v378_v48 }
  0xa8   : > { %703 = vmatmul.mubr.msk.f32.vlgmr.msra.gmra.mrb[0].mxu0 %vm382_vm10, %v380_v49 }
  0xa9   : > { %466 = vmatprep.mubr.f32.mxu0 %v772_v2  ;;  %v381_v2 = vld [vmem:[%s1097_s2 + $0x8] sm:$0xff] }
  0xac   : > { %704 = vmatmul.mubr.msk.f32.gmra.mrb[2].mxu0 %vm382_vm10, %v381_v2 }
 0x17b   : > { %v462_v52 = vpop.f32.mrb[0].mxu0 }
 0x17c   : > { %v473_v53 = vmul.f32 0.01, %v462_v52  ;;  %v464_v54 = vpop.f32.mrb[1].mxu0 }
 0x17d   : > { %v474_v55 = vmul.f32 0.01, %v464_v54 }
 0x17e   : > { %v1003_v56 = vmax.f32 %v462_v52, %v473_v53  ;;  %v544_v53 = vrot.slane %v823_v1, 4 }
 0x17f   : > { %v476_v57 = vmax.f32 %v464_v54, %v474_v55  ;;  %v543_v54 = vrot.slane %v817_v0, 4  ;;  %v468_v5 = vpop.f32.mrb[2].mxu0 }
 0x180   : > { %477 = vrot.lane.b32.xlu0 %v1003_v56, %s768_s24 }
 0x181   : > { %479 = vrot.lane.b32.xlu1 %v476_v57, %s768_s24 }
 0x184   : > { %485 = vrot.lane.b32.xlu0 %v1003_v56, %s767_s23 }
 0x185   : > { %487 = vrot.lane.b32.xlu1 %v476_v57, %s767_s23  ;;  %s199_s23 = scalar_lea.vmem %s1099_s4, %s696_s18 }
 0x188   : > { %493 = vrot.lane.b32.xlu0 %v1003_v56, %s769_s25 }
 0x189   : > { %495 = vrot.lane.b32.xlu1 %v476_v57, %s769_s25 }
 0x18c   : > { %501 = vrot.lane.b32.xlu0 %v1003_v56, %s766_s22 }
 0x18d   : > { %503 = vrot.lane.b32.xlu1 %v476_v57, %s766_s22 }
 0x190   : > { %509 = vrot.lane.b32.xlu0 %v1003_v56, %s770_s26 }
 0x191   : > { %511 = vrot.lane.b32.xlu1 %v476_v57, %s770_s26 }
 0x194   : > { %517 = vrot.lane.b32.xlu0 %v1003_v56, %s773_s28 }
 0x195   : > { %519 = vrot.lane.b32.xlu1 %v476_v57, %s773_s28 }
 0x198   : > { %525 = vrot.lane.b32.xlu0 %v1003_v56, %s771_s27 }
 0x199   : > { %527 = vrot.lane.b32.xlu1 %v476_v57, %s771_s27 }
 0x19c   : > { %533 = vrot.lane.b32.xlu0 %v1003_v56, %s774_s29 }
 0x19d   : > { %535 = vrot.lane.b32.xlu1 %v476_v57, %s774_s29 }
 0x1f2   : > { %v478_v58 = vpop.permute.xlu0 %477 }
 0x1f3   : > { %v480_v59 = vpop.permute.xlu1 %479 }
 0x1f4   : > { %v481_v60 = vsel %vm213_vm2, %v478_v58, %v480_v59  ;;  %v482_v61 = vsel %vm213_vm2, %v480_v59, %v478_v58  ;;  %v470_v58 = vpop.f32.mrb[3].mxu0 }
 0x1f5   : > { %v483_v11 = vmul.f32 %v482_v61, %v897_v25  ;;  %v484_v13 = vmul.f32 %v481_v60, %v900_v26 }
 0x1f6   : > { %v486_v3 = vpop.permute.xlu0 %485 }
 0x1f7   : > { %v488_v6 = vpop.permute.xlu1 %487 }
 0x1f8   : > { %v489_v7 = vsel %vm230_vm1, %v486_v3, %v488_v6  ;;  %v490_v8 = vsel %vm230_vm1, %v488_v6, %v486_v3 }
 0x1f9   : > { %v491_v12 = vmul.f32 %v490_v8, %v887_v20  ;;  %v492_v14 = vmul.f32 %v489_v7, %v890_v21 }
 0x1fa   : > { %v494_v4 = vpop.permute.xlu0 %493 }
 0x1fb   : > { %v496_v19 = vpop.permute.xlu1 %495  ;;  %v718_v22 = vpack.c.bf16 %v492_v14, %v484_v13  ;;  %v720_v23 = vpack.c.bf16 %v491_v12, %v483_v11 }
 0x1fc   : > { %v497_v24 = vsel %vm247_vm3, %v494_v4, %v496_v19  ;;  %v498_v27 = vsel %vm247_vm3, %v496_v19, %v494_v4 }
 0x1fd   : > { %719 = vmatprep.subr.bf16.mxu1 %v718_v22  ;;  %v499_v26 = vmul.f32 %v498_v27, %v912_v34  ;;  %v500_v29 = vmul.f32 %v497_v24, %v915_v35 }
 0x1fe   : > { %v502_v28 = vpop.permute.xlu0 %501  ;;  %721 = vmatpush1.bf16.msra.mxu1 %v720_v23 }
 0x1ff   : > { %v504_v25 = vpop.permute.xlu1 %503 }
 0x200   : > { %v505_v20 = vsel %vm264_vm0, %v502_v28, %v504_v25  ;;  %v506_v21 = vsel %vm264_vm0, %v504_v25, %v502_v28 }
 0x201   : > { %v507_v30 = vmul.f32 %v506_v21, %v875_v15  ;;  %v508_v9 = vmul.f32 %v505_v20, %v878_v16 }
 0x202   : > { %v510_v31 = vpop.permute.xlu0 %509 }
 0x203   : > { %v512_v33 = vpop.permute.xlu1 %511  ;;  %v722_v36 = vpack.c.bf16 %v508_v9, %v500_v29  ;;  %v724_v37 = vpack.c.bf16 %v507_v30, %v499_v26 }
 0x204   : > { %v513_v38 = vsel %vm281_vm5, %v510_v31, %v512_v33  ;;  %v514_v39 = vsel %vm281_vm5, %v512_v33, %v510_v31 }
 0x205   : > { %v515_v40 = vmul.f32 %v513_v38, %v929_v50  ;;  %v516_v34 = vmul.f32 %v514_v39, %v932_v51  ;;  %723 = vmatprep.subr.bf16.mxu1 %v722_v36 }
 0x206   : > { %v518_v35 = vpop.permute.xlu0 %517  ;;  %725 = vmatpush1.bf16.msra.mxu1 %v724_v37 }
 0x207   : > { %v520_v15 = vpop.permute.xlu1 %519  ;;  %v726_v41 = vpack.c.bf16 %v516_v34, %v476_v57  ;;  %v728_v16 = vpack.c.bf16 %v515_v40, %v1003_v56 }
 0x208   : > { %v521_v42 = vsel %vm298_vm7, %v518_v35, %v520_v15  ;;  %v522_v43 = vsel %vm298_vm7, %v520_v15, %v518_v35 }
 0x209   : > { %727 = vmatprep.subr.bf16.mxu1 %v726_v41  ;;  %v523_v46 = vmul.f32 %v521_v42, %v960_v17  ;;  %v524_v47 = vmul.f32 %v522_v43, %v963_v18 }
 0x20a   : > { %v526_v44 = vpop.permute.xlu0 %525  ;;  %729 = vmatpush1.bf16.msra.mxu1 %v728_v16 }
 0x20b   : > { %v528_v45 = vpop.permute.xlu1 %527 }
 0x20c   : > { %v529_v50 = vsel %vm315_vm6, %v526_v44, %v528_v45  ;;  %v530_v51 = vsel %vm315_vm6, %v528_v45, %v526_v44 }
 0x20d   : > { %v531_v48 = vmul.f32 %v529_v50, %v944_v62  ;;  %v532_v49 = vmul.f32 %v530_v51, %v947_v63  ;;  %v545_v63 = vld [vmem:[%s1098_s3] sm:$0xff] }
 0x20e   : > { %v534_v52 = vpop.permute.xlu0 %533 }
 0x20f   : > { %v536_v55 = vpop.permute.xlu1 %535  ;;  %v730_v56 = vpack.c.bf16 %v532_v49, %v524_v47  ;;  %v732_v57 = vpack.c.bf16 %v531_v48, %v523_v46 }
 0x210   : > { %v537_v2 = vsel %vm332_vm8, %v534_v52, %v536_v55  ;;  %v538_v17 = vsel %vm332_vm8, %v536_v55, %v534_v52 }
 0x211   : > { %v539_v18 = vmul.f32 %v975_v10, %v537_v2  ;;  %v540_v62 = vmul.f32 %v980_v32, %v538_v17  ;;  %731 = vmatprep.subr.bf16.mxu1 %v730_v56 }
 0x212   : > { %733 = vmatpush1.bf16.msra.mxu1 %v732_v57 }
 0x213   : > { %v734_v0 = vpack.c.bf16 %v544_v53, %v540_v62  ;;  %v737_v1 = vpack.c.bf16 %v543_v54, %v539_v18 }
 0x215   : > { %736 = vmatprep.subr.msk.bf16.mxu1 %vm735_vm13, %v734_v0 }
 0x216   : > { %739 = vmatpush1.bf16.msk.msra.mxu1 %vm735_vm13, %v737_v1 }
 0x219   : > { %707 = vmatmul.mubr.msk.f32.vlgmr.msra.gmra.mrb[0].mxu1 %vm546_vm14, %v545_v63 }
 0x2ec   : > { %v621_v10 = vpop.f32.mrb[0].mxu1 }
 0x2ed   : > { %v626_v59 = vmul.f32 0.01, %v621_v10  ;;  %v623_v32 = vpop.f32.mrb[1].mxu1 }
 0x2ee   : > { %v627_v60 = vmul.f32 0.01, %v623_v32 }
 0x2ef   : > { %v628_v61 = vmax.f32 %v621_v10, %v626_v59 }
 0x2f0   : > { %v629_v3 = vmax.f32 %v623_v32, %v627_v60 }
 0x2f1   : > { %v630_v6 = vadd.f32 %v628_v61, %v468_v5 }
 0x2f2   : > { %v631_v7 = vadd.f32 %v629_v3, %v470_v58 }
 0x2f3   : > { %632 = vst [vmem:[%s199_s23] sm:$0xff] %v630_v6 }
 0x2f4   : > { %633 = vst [vmem:[%s199_s23 + $0x8] sm:$0xff] %v631_v7 }
 0x2f5 PF: > { %s14_s15 = sadd.s32 1, %s764_s15  }
 0x2f6   : > { %p11_p4 = scmp.ge.s32.totalorder %s14_s15, 4  }
 0x2f8   :  { %13 = sbr.rel (!%p11_p4) target bundleno = 1 (0x1), region = 66 }

</bundles_post_ra>
